<compile_context>
chip_gen: v5e
topology: v5e:2x2
jax: 0.10.0
libtpu: 0.0.40
codegen_flags: <defaults>
</compile_context>

<pallas_src>
import functools

import jax
import jax.numpy as jnp
from jax.experimental import pallas as pl
from jax.experimental.pallas import tpu as pltpu


def _pick_tile(hw, frames, target):
    """Largest multiple-of-128 divisor of hw that is <= cap (per-frame column tile)."""
    if hw % 128 != 0:
        # A block equal to the full array dim is always legal; typical H*W is
        # 128-aligned so this fallback only triggers for odd shapes.
        return hw
    cap = target
    if frames == 1:
        # v7x has 2 TensorCores: keep >= 2 grid steps so the "parallel" axes
        # actually span both cores (v5e/v6e single-TC unaffected).
        cap = min(cap, max(128, (hw // 2) // 128 * 128))
    t = min(cap, hw) // 128 * 128
    while t >= 128:
        if hw % t == 0:
            return t
        t -= 128
    return hw


# ----------------------------------------------------------------------------
# Fused kernel: sparse-net stand-in + sky fill + head, one channel-major pass.
# ----------------------------------------------------------------------------
def fused_kernel(feat_ref, mask_ref, w_rgb_ref, b_sp_ref, sky_ref,
                 w_him_ref, w_hsp_ref, b_head_ref, out_ref):
    # feat_ref   : (C, T)     f32   frame pixels, rows 0:3 are rgb
    # mask_ref   : (1, T)     f32   1.0 where sqrt(sum(coord^2)) < 600 (city)
    # w_rgb_ref  : (Dm, 3)    bf16  sparse-net stand-in weight (rgb columns)
    # b_sp_ref   : (Dm, 1)    f32   noise @ w_sparse[noise rows]   (folded)
    # sky_ref    : (Dm, 1)    f32   init_sky
    # w_him_ref  : (Dout, 3)  bf16  head weight for rgb
    # w_hsp_ref  : (Dout, Dm) bf16  head weight for sparse_ft
    # b_head_ref : (Dout, 1)  f32   b_head + noise @ w_head[noise rows] (folded)
    # out_ref    : (Dout, T)  bf16  lane-dense output tile
    rgb = feat_ref[0:3, :].astype(jnp.bfloat16)                       # (3, T)
    is_city = mask_ref[...] != 0.0                                    # (1, T)

    # Sparse-net stand-in: pointwise conv (+ folded-noise bias) + ReLU, f32 acc.
    # TODO(synk): scn.ConcatUNet (submanifold sparse 3-D UNet with voxel
    #             hashing, strided downsampling, residual blocks) has no clean
    #             Pallas equivalent; approximated by this pointwise conv+ReLU.
    # TODO(synk): scn.BatchNormReLU is approximated by plain ReLU.
    h = jnp.dot(w_rgb_ref[...], rgb, preferred_element_type=jnp.float32)
    h = jnp.maximum(h + b_sp_ref[...], 0.0)                           # (Dm, T)
    sparse_ft = jnp.where(is_city, h, sky_ref[...])                   # sky fill

    # Head (RandLANet stand-in): pointwise linear over [rgb, sparse_ft, noise].
    # TODO(synk): RandLANet (kNN point-cloud net) has no clean Pallas
    #             equivalent; approximated by this pointwise linear head.
    out = jnp.dot(w_him_ref[...], rgb, preferred_element_type=jnp.float32)
    out = out + jnp.dot(w_hsp_ref[...], sparse_ft.astype(jnp.bfloat16),
                        preferred_element_type=jnp.float32)
    out_ref[...] = (out + b_head_ref[...]).astype(out_ref.dtype)


# ----------------------------------------------------------------------------
# Wrapper reproducing SparseConvNet.forward data flow
# ----------------------------------------------------------------------------
def sparse_conv_net_forward(im, coord, noise, params, *, tile_target=4096,
                            out_dtype=jnp.bfloat16):
    # im    : (B, F, C, H, W) f32  (B must be 1, as the reference assumes)
    # coord : (1, N, 3)       f32, N = F*H*W
    # noise : (1, d_noise)    f32
    B, Fr, C, H, W = im.shape
    assert B == 1, "reference forward assumes batch 1 (coord.size(0) == 1)"
    assert C >= 3
    HW = H * W
    d_in = 3

    w_sparse = params["w_sparse"]            # (d_in + d_noise, d_middle)
    w_head = params["w_head"]                # (d_in + d_middle + d_noise, d_out)
    d_middle = w_sparse.shape[1]
    d_out = w_head.shape[1]

    # Streamed operands, channel-major, no HBM copies:
    #  * im[0] -> (F, C, H*W) is a free contiguous reshape; the kernel slices
    #    the rgb rows itself, so the reference permute+reshape never
    #    materializes in HBM.
    feat = im[0].reshape(Fr, C, HW)
    #  * is_city is reduced here to a (F, 1, H*W) float mask (4 B/pt streamed)
    #    instead of 12 B/pt of coord.  sqrt(r2) < 600  <=>  r2 < 600^2 (r2>=0).
    coord3 = coord[0].reshape(Fr, HW, 3)
    is_city = (jnp.sum(coord3 * coord3, axis=-1)
               < jnp.float32(600.0 * 600.0)).astype(jnp.float32)
    is_city = is_city.reshape(Fr, 1, HW)

    # Fold the per-point-constant noise through the weights -> tiny biases,
    # and pre-transpose every weight into (out_channels, in_channels) form.
    w_rgb = jnp.transpose(w_sparse[:d_in]).astype(jnp.bfloat16)            # (Dm, 3)
    b_sparse = jnp.transpose(noise @ w_sparse[d_in:])                      # (Dm, 1)
    sky = jnp.transpose(params["init_sky"])                                # (Dm, 1)
    w_head_im = jnp.transpose(w_head[:d_in]).astype(jnp.bfloat16)          # (Dout, 3)
    w_head_sp = jnp.transpose(
        w_head[d_in:d_in + d_middle]).astype(jnp.bfloat16)                 # (Dout, Dm)
    b_head = jnp.transpose(
        params["b_head"] + noise @ w_head[d_in + d_middle:])               # (Dout, 1)

    thw = _pick_tile(HW, Fr, tile_target)
    grid = (Fr, HW // thw)   # exact tiling: no padding, no overhang

    out = pl.pallas_call(
        fused_kernel,
        out_shape=jax.ShapeDtypeStruct((Fr, d_out, HW), out_dtype),
        grid_spec=pltpu.PrefetchScalarGridSpec(
            num_scalar_prefetch=0,
            grid=grid,
            in_specs=[
                pl.BlockSpec((None, C, thw), lambda f, i: (f, 0, i)),    # pixels
                pl.BlockSpec((None, 1, thw), lambda f, i: (f, 0, i)),    # city mask
                pl.BlockSpec((d_middle, d_in), lambda f, i: (0, 0)),     # w_rgb
                pl.BlockSpec((d_middle, 1), lambda f, i: (0, 0)),        # b_sparse
                pl.BlockSpec((d_middle, 1), lambda f, i: (0, 0)),        # init_sky
                pl.BlockSpec((d_out, d_in), lambda f, i: (0, 0)),        # w_head_im
                pl.BlockSpec((d_out, d_middle), lambda f, i: (0, 0)),    # w_head_sp
                pl.BlockSpec((d_out, 1), lambda f, i: (0, 0)),           # b_head
            ],
            out_specs=pl.BlockSpec((None, d_out, thw), lambda f, i: (f, 0, i)),
        ),
        compiler_params=pltpu.CompilerParams(
            # Every grid step writes a distinct output tile -> fully parallel;
            # on v7x the (frame, column-tile) axes shard over both TensorCores.
            dimension_semantics=("parallel", "parallel"),
        ),
    )(feat, is_city, w_rgb, b_sparse, sky, w_head_im, w_head_sp, b_head)

    # (F, d_out, H*W) -> (B=1, F, d_out, H, W): free contiguous reshape — the
    # kernel already emits channel-major per frame, so no transpose is needed.
    out_3d = out.reshape(Fr, d_out, H, W)[None]
    return out_3d, None


def init_params(key, d_in, d_noise, d_out, ngf):
    k1, k2, k3, k4 = jax.random.split(key, 4)
    d_middle = ngf
    kin_sparse = d_in + d_noise
    kin_head = d_in + d_middle + d_noise
    return {
        "w_sparse": jax.random.normal(k1, (kin_sparse, d_middle), jnp.float32) * 0.1,
        "init_sky": jax.random.normal(k2, (1, d_middle), jnp.float32),
        "w_head": jax.random.normal(k3, (kin_head, d_out), jnp.float32) * 0.1,
        "b_head": jax.random.normal(k4, (1, d_out), jnp.float32) * 0.1,
    }


def _reference_forward(im, coord, noise, params):
    """Pure-JAX point-major f32 reference of the same (approximated) network."""
    B, Fr, C, H, W = im.shape
    N = Fr * H * W
    d_in = 3
    w_sparse = params["w_sparse"]
    w_head = params["w_head"]
    d_out = w_head.shape[1]
    im_ft = jnp.transpose(im[:, :, :d_in], (0, 1, 3, 4, 2)).reshape(N, d_in)
    is_city = jnp.sqrt(jnp.sum(coord[0] ** 2, axis=-1)) < 600.0        # (N,)
    noise_ft = jnp.broadcast_to(noise, (N, noise.shape[1]))
    loc_ft = jnp.concatenate([im_ft, noise_ft], axis=1)
    h = jnp.maximum(loc_ft @ w_sparse, 0.0)                            # (N, Dm)
    sparse_ft = jnp.where(is_city[:, None], h, params["init_sky"])
    head_in = jnp.concatenate([im_ft, sparse_ft, noise_ft], axis=1)
    out = head_in @ w_head + params["b_head"]                          # (N, d_out)
    return jnp.transpose(out.reshape(Fr, H, W, d_out), (0, 3, 1, 2))[None]


if __name__ == "__main__":
    # Small shapes consistent with the forward: B=1, F=2, C=4, H=W=16 -> N=512.
    B, Fr, C, H, W = 1, 2, 4, 16, 16
    N = Fr * H * W
    d_in, d_noise, d_out, ngf = 3, 8, 3, 32

    key = jax.random.PRNGKey(0)
    k_im, k_coord, k_noise, k_par = jax.random.split(key, 4)

    im = jax.random.normal(k_im, (B, Fr, C, H, W), jnp.float32)
    # radii spread around 600 so both city and sky branches are exercised
    coord = jax.random.uniform(
        k_coord, (1, N, 3), jnp.float32, minval=0.0, maxval=700.0
    )
    noise = jax.random.normal(k_noise, (1, d_noise), jnp.float32)

    params = init_params(k_par, d_in, d_noise, d_out, ngf)

    fwd = jax.jit(functools.partial(sparse_conv_net_forward, params=params))
    out_3d, _ = fwd(im, coord, noise)
    jax.block_until_ready(out_3d)

    assert out_3d.shape == (B, Fr, d_out, H, W), out_3d.shape
    assert not bool(jnp.isnan(out_3d).any())

    # Numerical check against the pure-JAX f32 reference (kernel runs bf16).
    ref = _reference_forward(im, coord, noise, params)
    err = float(jnp.max(jnp.abs(out_3d.astype(jnp.float32) - ref)))
    assert err < 0.1, f"max abs err vs reference: {err}"

    print("KERNEL_OK")
</pallas_src>

<mosaic_0001>
module attributes {stable_mosaic.version = 11 : i64} {
  func.func @fused_kernel(%arg0: i32, %arg1: i32, %arg2: memref<1x4x256xf32, #tpu.memory_space<vmem>>, %arg3: memref<1x1x256xf32, #tpu.memory_space<vmem>>, %arg4: memref<32x3xbf16, #tpu.memory_space<vmem>>, %arg5: memref<32x1xf32, #tpu.memory_space<vmem>>, %arg6: memref<32x1xf32, #tpu.memory_space<vmem>>, %arg7: memref<3x3xbf16, #tpu.memory_space<vmem>>, %arg8: memref<3x32xbf16, #tpu.memory_space<vmem>>, %arg9: memref<3x1xf32, #tpu.memory_space<vmem>>, %arg10: memref<1x3x256xbf16, #tpu.memory_space<vmem>>) attributes {dimension_semantics = [#tpu.dimension_semantics<parallel>, #tpu.dimension_semantics<parallel>], iteration_bounds = array<i64: 2, 1>, scalar_prefetch = 0 : i64, scratch_operands = 0 : i64, tpu.core_type = #tpu.core_type<tc>, window_params = [{transform_indices = @transform_0, window_bounds = array<i64: 1, 4, 256>}, {transform_indices = @transform_1, window_bounds = array<i64: 1, 1, 256>}, {pipeline_mode = #tpu.pipeline_mode<synchronous>, transform_indices = @transform_2, window_bounds = array<i64: 32, 3>}, {pipeline_mode = #tpu.pipeline_mode<synchronous>, transform_indices = @transform_3, window_bounds = array<i64: 32, 1>}, {pipeline_mode = #tpu.pipeline_mode<synchronous>, transform_indices = @transform_4, window_bounds = array<i64: 32, 1>}, {pipeline_mode = #tpu.pipeline_mode<synchronous>, transform_indices = @transform_5, window_bounds = array<i64: 3, 3>}, {pipeline_mode = #tpu.pipeline_mode<synchronous>, transform_indices = @transform_6, window_bounds = array<i64: 3, 32>}, {pipeline_mode = #tpu.pipeline_mode<synchronous>, transform_indices = @transform_7, window_bounds = array<i64: 3, 1>}, {transform_indices = @transform_8, window_bounds = array<i64: 1, 3, 256>}]} {
    %c0 = arith.constant 0 : index
    %c0_0 = arith.constant 0 : index
    %c0_1 = arith.constant 0 : index
    %0 = vector.load %arg2[%c0, %c0_0, %c0_1] : memref<1x4x256xf32, #tpu.memory_space<vmem>>, vector<1x3x256xf32>
    %1 = vector.shape_cast %0 : vector<1x3x256xf32> to vector<3x256xf32>
    %2 = arith.truncf %1 : vector<3x256xf32> to vector<3x256xbf16>
    %c0_2 = arith.constant 0 : index
    %c0_3 = arith.constant 0 : index
    %c0_4 = arith.constant 0 : index
    %3 = vector.load %arg3[%c0_2, %c0_3, %c0_4] : memref<1x1x256xf32, #tpu.memory_space<vmem>>, vector<1x1x256xf32>
    %4 = vector.shape_cast %3 : vector<1x1x256xf32> to vector<1x256xf32>
    %cst = arith.constant 0.000000e+00 : f32
    %5 = vector.broadcast %cst : f32 to vector<1x256xf32>
    %6 = arith.cmpf one, %4, %5 : vector<1x256xf32>
    %c0_5 = arith.constant 0 : index
    %c0_6 = arith.constant 0 : index
    %7 = vector.load %arg4[%c0_5, %c0_6] : memref<32x3xbf16, #tpu.memory_space<vmem>>, vector<32x3xbf16>
    %cst_7 = arith.constant dense<0.000000e+00> : vector<32x256xf32>
    %8 = tpu.matmul %7, %2, %cst_7 {dimension_numbers = #tpu.dot_dimension_numbers<[1], [0], [0], [1], [0, 0, 1, 1], [], []>} : vector<32x3xbf16>, vector<3x256xbf16>, vector<32x256xf32> -> vector<32x256xf32>
    %c0_8 = arith.constant 0 : index
    %c0_9 = arith.constant 0 : index
    %9 = vector.load %arg5[%c0_8, %c0_9] : memref<32x1xf32, #tpu.memory_space<vmem>>, vector<32x1xf32>
    %10 = vector.broadcast %9 : vector<32x1xf32> to vector<32x256xf32>
    %11 = arith.addf %8, %10 : vector<32x256xf32>
    %cst_10 = arith.constant 0.000000e+00 : f32
    %12 = vector.broadcast %cst_10 : f32 to vector<32x256xf32>
    %13 = arith.maximumf %11, %12 : vector<32x256xf32>
    %c0_11 = arith.constant 0 : index
    %c0_12 = arith.constant 0 : index
    %14 = vector.load %arg6[%c0_11, %c0_12] : memref<32x1xf32, #tpu.memory_space<vmem>>, vector<32x1xf32>
    %15 = vector.shape_cast %6 : vector<1x256xi1> to vector<1x256xi1>
    %16 = vector.broadcast %15 : vector<1x256xi1> to vector<32x256xi1>
    %17 = vector.shape_cast %14 : vector<32x1xf32> to vector<32x1xf32>
    %18 = vector.broadcast %17 : vector<32x1xf32> to vector<32x256xf32>
    %19 = arith.select %16, %13, %18 : vector<32x256xi1>, vector<32x256xf32>
    %c0_13 = arith.constant 0 : index
    %c0_14 = arith.constant 0 : index
    %20 = vector.load %arg7[%c0_13, %c0_14] : memref<3x3xbf16, #tpu.memory_space<vmem>>, vector<3x3xbf16>
    %cst_15 = arith.constant dense<0.000000e+00> : vector<3x256xf32>
    %21 = tpu.matmul %20, %2, %cst_15 {dimension_numbers = #tpu.dot_dimension_numbers<[1], [0], [0], [1], [0, 0, 1, 1], [], []>} : vector<3x3xbf16>, vector<3x256xbf16>, vector<3x256xf32> -> vector<3x256xf32>
    %c0_16 = arith.constant 0 : index
    %c0_17 = arith.constant 0 : index
    %22 = vector.load %arg8[%c0_16, %c0_17] : memref<3x32xbf16, #tpu.memory_space<vmem>>, vector<3x32xbf16>
    %23 = arith.truncf %19 : vector<32x256xf32> to vector<32x256xbf16>
    %cst_18 = arith.constant dense<0.000000e+00> : vector<3x256xf32>
    %24 = tpu.matmul %22, %23, %cst_18 {dimension_numbers = #tpu.dot_dimension_numbers<[1], [0], [0], [1], [0, 0, 1, 1], [], []>} : vector<3x32xbf16>, vector<32x256xbf16>, vector<3x256xf32> -> vector<3x256xf32>
    %25 = arith.addf %21, %24 : vector<3x256xf32>
    %c0_19 = arith.constant 0 : index
    %c0_20 = arith.constant 0 : index
    %26 = vector.load %arg9[%c0_19, %c0_20] : memref<3x1xf32, #tpu.memory_space<vmem>>, vector<3x1xf32>
    %27 = vector.broadcast %26 : vector<3x1xf32> to vector<3x256xf32>
    %28 = arith.addf %25, %27 : vector<3x256xf32>
    %29 = arith.truncf %28 : vector<3x256xf32> to vector<3x256xbf16>
    %c0_21 = arith.constant 0 : index
    %c0_22 = arith.constant 0 : index
    %c0_23 = arith.constant 0 : index
    %30 = vector.load %arg10[%c0_21, %c0_22, %c0_23] : memref<1x3x256xbf16, #tpu.memory_space<vmem>>, vector<1x3x256xbf16>
    %31 = vector.shape_cast %30 : vector<1x3x256xbf16> to vector<3x256xbf16>
    %32 = vector.shape_cast %29 : vector<3x256xbf16> to vector<1x3x256xbf16>
    tpu.vector_store %arg10[%c0_21, %c0_22, %c0_23], %32 {strides = array<i32>} : memref<1x3x256xbf16, #tpu.memory_space<vmem>>, vector<1x3x256xbf16>,
    return
  }
  func.func @transform_0(%arg0: i32, %arg1: i32) -> (i32, i32, i32) {
    %c0_i32 = arith.constant 0 : i32
    %c0_i32_0 = arith.constant 0 : i32
    return %arg0, %c0_i32, %arg1 : i32, i32, i32
  }
  func.func @transform_1(%arg0: i32, %arg1: i32) -> (i32, i32, i32) {
    %c0_i32 = arith.constant 0 : i32
    %c0_i32_0 = arith.constant 0 : i32
    return %arg0, %c0_i32, %arg1 : i32, i32, i32
  }
  func.func @transform_2(%arg0: i32, %arg1: i32) -> (i32, i32) {
    %c0_i32 = arith.constant 0 : i32
    %c0_i32_0 = arith.constant 0 : i32
    %c0_i32_1 = arith.constant 0 : i32
    return %c0_i32, %c0_i32_0 : i32, i32
  }
  func.func @transform_3(%arg0: i32, %arg1: i32) -> (i32, i32) {
    %c0_i32 = arith.constant 0 : i32
    %c0_i32_0 = arith.constant 0 : i32
    %c0_i32_1 = arith.constant 0 : i32
    return %c0_i32, %c0_i32_0 : i32, i32
  }
  func.func @transform_4(%arg0: i32, %arg1: i32) -> (i32, i32) {
    %c0_i32 = arith.constant 0 : i32
    %c0_i32_0 = arith.constant 0 : i32
    %c0_i32_1 = arith.constant 0 : i32
    return %c0_i32, %c0_i32_0 : i32, i32
  }
  func.func @transform_5(%arg0: i32, %arg1: i32) -> (i32, i32) {
    %c0_i32 = arith.constant 0 : i32
    %c0_i32_0 = arith.constant 0 : i32
    %c0_i32_1 = arith.constant 0 : i32
    return %c0_i32, %c0_i32_0 : i32, i32
  }
  func.func @transform_6(%arg0: i32, %arg1: i32) -> (i32, i32) {
    %c0_i32 = arith.constant 0 : i32
    %c0_i32_0 = arith.constant 0 : i32
    %c0_i32_1 = arith.constant 0 : i32
    return %c0_i32, %c0_i32_0 : i32, i32
  }
  func.func @transform_7(%arg0: i32, %arg1: i32) -> (i32, i32) {
    %c0_i32 = arith.constant 0 : i32
    %c0_i32_0 = arith.constant 0 : i32
    %c0_i32_1 = arith.constant 0 : i32
    return %c0_i32, %c0_i32_0 : i32, i32
  }
  func.func @transform_8(%arg0: i32, %arg1: i32) -> (i32, i32, i32) {
    %c0_i32 = arith.constant 0 : i32
    %c0_i32_0 = arith.constant 0 : i32
    return %arg0, %c0_i32, %arg1 : i32, i32, i32
  }
}

</mosaic_0001>

<bundles_post_ra>
// kernel: squeeze.2
= control target key start
LH: loop header
LB: loop body
LE: loop exit
PB: predicated region body
PF: predicated region fallthrough
CT: control target
= control target key end

     0   :  { %2 = vsyncpa [#allocation1], 0  ;;  %s446_s8 = smov [#allocation0]   ;;  %s533_s0 = inlined_call_operand.hbm [shape: f32[1,2,4,16,16], index: 0, kind: input, shape index: {}]   ;;  %s534_s1 = inlined_call_operand.vmem [shape: f32[2,4,256], index: 1, kind: output, shape index: {}]  }
   0x1   :  { %s6_s0 = sshll.u32 %s533_s0, 4  ;;  %s8_s9 = sshll.u32 %s446_s8, 4  ;;  %s7_s0 = int_to_ptr.hbm [resolvable:$true] %s6_s0  ;;  %s9_s9 = int_to_ptr.vmem [resolvable:$true] %s8_s9 }
   0x2   :  { %11 = dma.hbm_to_vmem [thread:$0]  %s7_s0, 2048, %s9_s9, [#allocation1]  }
   0x3   :  { %444 = dma.done.wait [#allocation1], 2048  }
   0x4   :  { %445 = vsyncadd [#allocation1], 4294965248  ;;  %s91_s10 = smov 3  ;;  %s94_s11 = smov 12  ;;  %vm47_vm0 = vcmask 1043458   ;;  %vm52_vm1 = vcmask 1045508  }
   0x5   :  { %s99_s12 = smov 48  ;;  %s104_s13 = smov 192  ;;  %vm57_vm2 = vcmask 1047558   ;;  %v92_v0 = vld [vmem:[#allocation0 + $0x6] ss:$16 sm:%s91_s10]   ;;  %vm16_vm3 = vcmask 1047556  }
   0x6   :  { %s42_s14 = smov 3  ;;  %s45_s15 = smov 12  ;;  %v95_v1 = vld [vmem:[#allocation0 + $0x6] ss:$16 sm:%s94_s11]   ;;  %v100_v2 = vld [vmem:[#allocation0 - $0x32] ss:$16 sm:%s99_s12]  }
   0x7   :  { %s50_s16 = smov 48  ;;  %s55_s17 = smov 192  ;;  %v97_v3 = vsel %vm47_vm0, %v95_v1, %v92_v0  ;;  %v105_v4 = vld [vmem:[#allocation0 - $0x32] ss:$16 sm:%s104_s13]   ;;  %v43_v5 = vld [vmem:[#allocation0 + $0x7] ss:$16 sm:%s42_s14]  }
   0x8   :  { %s115_s18 = smov 3  ;;  %s118_s19 = smov 12  ;;  %v46_v6 = vld [vmem:[#allocation0 + $0x7] ss:$16 sm:%s45_s15]   ;;  %v102_v7 = vsel %vm52_vm1, %v100_v2, %v97_v3  ;;  %v51_v9 = vld [vmem:[#allocation0 - $0x31] ss:$16 sm:%s50_s16]  }
   0x9   :  { %s123_s20 = smov 48  ;;  %v48_v8 = vsel %vm47_vm0, %v46_v6, %v43_v5  ;;  %v56_v10 = vld [vmem:[#allocation0 - $0x31] ss:$16 sm:%s55_s17]   ;;  %v116_v11 = vld [vmem:[#allocation0 + $0x46] ss:$16 sm:%s115_s18]   ;;  %v107_v12 = vsel %vm57_vm2, %v105_v4, %v102_v7  ;;  %s128_s21 = smov 192 }
   0xa   :  { %v53_v13 = vsel %vm52_vm1, %v51_v9, %v48_v8  ;;  %v119_v14 = vld [vmem:[#allocation0 + $0x46] ss:$16 sm:%s118_s19]   ;;  %v124_v15 = vld [vmem:[#allocation0 + $0xe] ss:$16 sm:%s123_s20]   ;;  %s66_s22 = smov 3  ;;  %s447_s23 = smov 96  }
   0xb   :  { %108 = vrot.lane.b32.xlu1 %v107_v12, %s447_s23  ;;  %v58_v16 = vsel %vm57_vm2, %v56_v10, %v53_v13  ;;  %v121_v17 = vsel %vm47_vm0, %v119_v14, %v116_v11  ;;  %v67_v18 = vld [vmem:[#allocation0 + $0x47] ss:$16 sm:%s66_s22]   ;;  %s69_s24 = smov 12  ;;  %s74_s25 = smov 48  ;;  %v129_v22 = vld [vmem:[#allocation0 + $0xe] ss:$16 sm:%s128_s21]  }
   0xc   :  { %s448_s26 = smov 112   ;;  %v70_v19 = vld [vmem:[#allocation0 + $0x47] ss:$16 sm:%s69_s24]   ;;  %v75_v20 = vld [vmem:[#allocation0 + $0xf] ss:$16 sm:%s74_s25]   ;;  %s79_s27 = smov 192  ;;  %v126_v21 = vsel %vm52_vm1, %v124_v15, %v121_v17 }
   0xd   :  { %59 = vrot.lane.b32.xlu0 %v58_v16, %s448_s26  ;;  %v72_v23 = vsel %vm47_vm0, %v70_v19, %v67_v18  ;;  %s213_s28 = smov 3  ;;  %s216_s29 = smov 12  ;;  %v80_v25 = vld [vmem:[#allocation0 + $0xf] ss:$16 sm:%s79_s27]   ;;  %v131_v28 = vsel %vm57_vm2, %v129_v22, %v126_v21  ;;  %vm18_vm4 = vcmask 130048   ;;  %vm61_vm5 = vcmask 1048448  }
   0xe   :  { %v77_v24 = vsel %vm52_vm1, %v75_v20, %v72_v23  ;;  %s221_s30 = smov 48  ;;  %v214_v26 = vld [vmem:[#allocation0 + $0x44] ss:$16 sm:%s213_s28]   ;;  %s189_s2 = smov 3  ;;  %vm110_vm6 = vcmask 917248   ;;  %vm159_vm7 = vcmask 786048  }
   0xf   :  { %v217_v27 = vld [vmem:[#allocation0 + $0x44] ss:$16 sm:%s216_s29]   ;;  %s192_s3 = smov 12  ;;  %s197_s4 = smov 48  ;;  %v82_v31 = vsel %vm57_vm2, %v80_v25, %v77_v24  ;;  %v222_v33 = vld [vmem:[#allocation0 + $0xc] ss:$16 sm:%s221_s30]  }
  0x10   :  { %v190_v29 = vld [vmem:[#allocation0 + $0x4] ss:$16 sm:%s189_s2]   ;;  %s226_s5 = smov 192  ;;  %s202_s6 = smov 192  ;;  %v219_v32 = vsel %vm47_vm0, %v217_v27, %v214_v26  ;;  %v198_v35 = vld [vmem:[#allocation0 - $0x34] ss:$16 sm:%s197_s4]  }
  0x11   :  { %v193_v30 = vld [vmem:[#allocation0 + $0x4] ss:$16 sm:%s192_s3]   ;;  %s287_s7 = smov 3  ;;  %s290_s0 = smov 12  ;;  %v227_v36 = vld [vmem:[#allocation0 + $0xc] ss:$16 sm:%s226_s5]   ;;  %v224_v38 = vsel %vm52_vm1, %v222_v33, %v219_v32 }
  0x12   :  { %v195_v34 = vsel %vm47_vm0, %v193_v30, %v190_v29  ;;  %v203_v37 = vld [vmem:[#allocation0 - $0x34] ss:$16 sm:%s202_s6]   ;;  %s262_s8 = smov 3  ;;  %s265_s9 = smov 12  ;;  %v288_v39 = vld [vmem:[#allocation0 + $0x2] ss:$16 sm:%s287_s7]   ;;  %v229_v46 = vsel %vm57_vm2, %v227_v36, %v224_v38 }
  0x13   :  { %132 = vrot.lane.b32.xlu1 %v131_v28, %s447_s23  ;;  %v291_v40 = vld [vmem:[#allocation0 + $0x2] ss:$16 sm:%s290_s0]   ;;  %s295_s10 = smov 48  ;;  %v200_v41 = vsel %vm52_vm1, %v198_v35, %v195_v34  ;;  %v263_v42 = vld [vmem:[#allocation0 + $0x43] ss:$16 sm:%s262_s8]   ;;  %s140_s11 = smov 3 }
  0x14   :  { %v266_v43 = vld [vmem:[#allocation0 + $0x43] ss:$16 sm:%s265_s9]   ;;  %s143_s12 = smov 12  ;;  %v141_v44 = vld [vmem:[#allocation0 + $0x5] ss:$16 sm:%s140_s11]   ;;  %s148_s13 = smov 48  ;;  %v205_v50 = vsel %vm57_vm2, %v203_v37, %v200_v41  ;;  %v293_v52 = vsel %vm47_vm0, %v291_v40, %v288_v39 }
  0x15   :  { %83 = vrot.lane.b32.xlu0 %v82_v31, %s448_s26  ;;  %v144_v45 = vld [vmem:[#allocation0 + $0x5] ss:$16 sm:%s143_s12]   ;;  %s153_s14 = smov 192  ;;  %s270_s15 = smov 48  ;;  %v149_v48 = vld [vmem:[#allocation0 - $0x33] ss:$16 sm:%s148_s13]   ;;  %v268_v55 = vsel %vm47_vm0, %v266_v43, %v263_v42 }
  0x16   :  { %v146_v47 = vsel %vm47_vm0, %v144_v45, %v141_v44  ;;  %v154_v49 = vld [vmem:[#allocation0 - $0x33] ss:$16 sm:%s153_s14]   ;;  %s300_s16 = smov 192  ;;  %s275_s17 = smov 192  ;;  %v296_v53 = vld [vmem:[#allocation0 - $0x36] ss:$16 sm:%s295_s10]  }
  0x17   :  { %v151_v51 = vsel %vm52_vm1, %v149_v48, %v146_v47  ;;  %s360_s18 = smov 3  ;;  %s363_s19 = smov 12  ;;  %v271_v56 = vld [vmem:[#allocation0 + $0xb] ss:$16 sm:%s270_s15]   ;;  %v301_v57 = vld [vmem:[#allocation0 - $0x36] ss:$16 sm:%s300_s16]   ;;  %v298_v59 = vsel %vm52_vm1, %v296_v53, %v293_v52 }
  0x18   :  { %v156_v54 = vsel %vm57_vm2, %v154_v49, %v151_v51  ;;  %s449_s20 = smov 64   ;;  %s450_s21 = smov 80   ;;  %v276_v58 = vld [vmem:[#allocation0 + $0xb] ss:$16 sm:%s275_s17]   ;;  %v361_v60 = vld [vmem:[#allocation0 + $0x41] ss:$16 sm:%s360_s18]   ;;  %v273_v62 = vsel %vm52_vm1, %v271_v56, %v268_v55  ;;  %v303_v6 = vsel %vm57_vm2, %v301_v57, %v298_v59 }
  0x19   :  { %157 = vrot.lane.b32.xlu2 %v156_v54, %s450_s21  ;;  %s336_s22 = smov 3  ;;  %s339_s23 = smov 12  ;;  %v364_v61 = vld [vmem:[#allocation0 + $0x41] ss:$16 sm:%s363_s19]   ;;  %v278_v10 = vsel %vm57_vm2, %v276_v58, %v273_v62  ;;  %vm208_vm8 = vcmask 654848   ;;  %vm257_vm9 = vcmask 523648  }
  0x1a   :  { %s368_s24 = smov 48  ;;  %s164_s25 = smov 3  ;;  %v337_v63 = vld [vmem:[#allocation0 + $0x1] ss:$16 sm:%s336_s22]   ;;  %v366_v12 = vsel %vm47_vm0, %v364_v61, %v361_v60  ;;  %vm306_vm10 = vcmask 392448   ;;  %vm355_vm11 = vcmask 261248  }
  0x1b   :  { %230 = vrot.lane.b32.xlu1 %v229_v46, %s449_s20  ;;  %s167_s26 = smov 12  ;;  %v340_v0 = vld [vmem:[#allocation0 + $0x1] ss:$16 sm:%s339_s23]   ;;  %v165_v1 = vld [vmem:[#allocation0 + $0x45] ss:$16 sm:%s164_s25]   ;;  %s172_s27 = smov 48 }
  0x1c   :  { %v168_v2 = vld [vmem:[#allocation0 + $0x45] ss:$16 sm:%s167_s26]   ;;  %s177_s28 = smov 192  ;;  %v173_v4 = vld [vmem:[#allocation0 + $0xd] ss:$16 sm:%s172_s27]   ;;  %s238_s29 = smov 3  ;;  %v342_v16 = vsel %vm47_vm0, %v340_v0, %v337_v63 }
  0x1d   :  { %206 = vrot.lane.b32.xlu0 %v205_v50, %s449_s20  ;;  %v170_v3 = vsel %vm47_vm0, %v168_v2, %v165_v1  ;;  %v178_v5 = vld [vmem:[#allocation0 + $0xd] ss:$16 sm:%s177_s28]   ;;  %s241_s30 = smov 12  ;;  %s344_s2 = smov 48  ;;  %v239_v8 = vld [vmem:[#allocation0 + $0x3] ss:$16 sm:%s238_s29]  }
  0x1e   :  { %v175_v7 = vsel %vm52_vm1, %v173_v4, %v170_v3  ;;  %v242_v9 = vld [vmem:[#allocation0 + $0x3] ss:$16 sm:%s241_s30]   ;;  %s246_s3 = smov 48  ;;  %v369_v13 = vld [vmem:[#allocation0 + $0x9] ss:$16 sm:%s368_s24]   ;;  %s373_s4 = smov 192 }
  0x1f   :  { %v180_v11 = vsel %vm57_vm2, %v178_v5, %v175_v7  ;;  %v244_v14 = vsel %vm47_vm0, %v242_v9, %v239_v8  ;;  %v247_v15 = vld [vmem:[#allocation0 - $0x35] ss:$16 sm:%s246_s3]   ;;  %s251_s5 = smov 192  ;;  %s451_s6 = smov 32   ;;  %v345_v17 = vld [vmem:[#allocation0 - $0x37] ss:$16 sm:%s344_s2]   ;;  %v371_v18 = vsel %vm52_vm1, %v369_v13, %v366_v12 }
  0x20   :  { %s349_s7 = smov 192  ;;  %s452_s0 = smov 48   ;;  %v374_v19 = vld [vmem:[#allocation0 + $0x9] ss:$16 sm:%s373_s4]   ;;  %v249_v20 = vsel %vm52_vm1, %v247_v15, %v244_v14  ;;  %v252_v21 = vld [vmem:[#allocation0 - $0x35] ss:$16 sm:%s251_s5]   ;;  %v347_v22 = vsel %vm52_vm1, %v345_v17, %v342_v16 }
  0x21   :  { %181 = vrot.lane.b32.xlu2 %v180_v11, %s450_s21  ;;  %s311_s8 = smov 3  ;;  %s314_s9 = smov 12  ;;  %v350_v23 = vld [vmem:[#allocation0 - $0x37] ss:$16 sm:%s349_s7]   ;;  %v376_v26 = vsel %vm57_vm2, %v374_v19, %v371_v18  ;;  %v254_v27 = vsel %vm57_vm2, %v252_v21, %v249_v20 }
  0x22   :  { %v312_v24 = vld [vmem:[#allocation0 + $0x42] ss:$16 sm:%s311_s8]   ;;  %s319_s10 = smov 48  ;;  %v352_v28 = vsel %vm57_vm2, %v350_v23, %v347_v22  ;;  %s324_s11 = smov 192 }
  0x23   :  { %304 = vrot.lane.b32.xlu1 %v303_v6, %s451_s6  ;;  %v315_v25 = vld [vmem:[#allocation0 + $0x42] ss:$16 sm:%s314_s9]   ;;  %v320_v30 = vld [vmem:[#allocation0 + $0xa] ss:$16 sm:%s319_s10]   ;;  %s453_s12 = smov 16  }
  0x24   :  { %v317_v29 = vsel %vm47_vm0, %v315_v25, %v312_v24  ;;  %v325_v32 = vld [vmem:[#allocation0 + $0xa] ss:$16 sm:%s324_s11]   ;;  %v14_v34 = vld [vmem:[#allocation0] ss:$8 sm:$0xf]  }
  0x25   :  { %279 = vrot.lane.b32.xlu0 %v278_v10, %s452_s0  ;;  %v322_v31 = vsel %vm52_vm1, %v320_v30, %v317_v29  ;;  %v15_v35 = vld [vmem:[#allocation0] ss:$8 sm:$0xf0]  }
  0x26   :  { %v327_v33 = vsel %vm57_vm2, %v325_v32, %v322_v31  ;;  %v17_v36 = vsel %vm16_vm3, %v15_v35, %v14_v34  ;;  %v27_v37 = vld [vmem:[#allocation0 + $0x40] ss:$8 sm:$0xf]  }
  0x27   :  { %19 = vst.msk [vmem:[#allocation2] ss:$8 sm:$0x3] %vm18_vm4, %v17_v36   ;;  %v29_v38 = vld [vmem:[#allocation0 + $0x40] ss:$8 sm:$0xf0]  }
  0x28   :  { %21 = vst.msk [vmem:[#allocation2 - $0xf] ss:$8 sm:$0xc] %vm18_vm4, %v17_v36   ;;  %v31_v39 = vsel %vm16_vm3, %v29_v38, %v27_v37 }
  0x29   :  { %255 = vrot.lane.b32.xlu2 %v254_v27, %s452_s0  ;;  %23 = vst.msk [vmem:[#allocation2 - $0x1e] ss:$8 sm:$0x30] %vm18_vm4, %v17_v36  }
  0x2a   :  { %25 = vst.msk [vmem:[#allocation2 - $0x2d] ss:$8 sm:$0xc0] %vm18_vm4, %v17_v36  }
  0x2b   :  { %377 = vrot.lane.b32.xlu1 %v376_v26, %s453_s12  ;;  %34 = vst.msk [vmem:[#allocation2 + $0x10] ss:$8 sm:$0x3] %vm18_vm4, %v31_v39  }
  0x2c   :  { %36 = vst.msk [vmem:[#allocation2 + $0x1] ss:$8 sm:$0xc] %vm18_vm4, %v31_v39  }
  0x2d   :  { %353 = vrot.lane.b32.xlu0 %v352_v28, %s453_s12  ;;  %38 = vst.msk [vmem:[#allocation2 - $0xe] ss:$8 sm:$0x30] %vm18_vm4, %v31_v39  }
  0x2e   :  { %40 = vst.msk [vmem:[#allocation2 - $0x1d] ss:$8 sm:$0xc0] %vm18_vm4, %v31_v39  }
  0x31   :  { %328 = vrot.lane.b32.xlu2 %v327_v33, %s451_s6 }
  0x73   :  { %v158_v40 = vpop.permute.xlu2 %157  }
  0x7b   :  { %v182_v42 = vpop.permute.xlu2 %181  }
  0x7d   :  { %v109_v41 = vpop.permute.xlu1 %108  }
  0x7f   :  { %v60_v43 = vpop.permute.xlu0 %59  }
  0x80   :  { %62 = vst.msk [vmem:[#allocation2] sm:$0xf] %vm61_vm5, %v60_v43  }
  0x81   :  { %64 = vst.msk [vmem:[#allocation2 + $0x4] sm:$0xf0] %vm61_vm5, %v60_v43  }
  0x82   :  { %111 = vst.msk [vmem:[#allocation2] sm:$0xf] %vm110_vm6, %v109_v41  }
  0x83   :  { %113 = vst.msk [vmem:[#allocation2 + $0x4] sm:$0xf0] %vm110_vm6, %v109_v41   ;;  %v256_v45 = vpop.permute.xlu2 %255  }
  0x84   :  { %160 = vst.msk [vmem:[#allocation2] sm:$0xf] %vm159_vm7, %v158_v40  }
  0x85   :  { %162 = vst.msk [vmem:[#allocation2 + $0x4] sm:$0xf0] %vm159_vm7, %v158_v40   ;;  %v133_v44 = vpop.permute.xlu1 %132  }
  0x87   :  { %v84_v46 = vpop.permute.xlu0 %83  }
  0x88   :  { %87 = vst.msk [vmem:[#allocation2 + $0x10] sm:$0xf] %vm61_vm5, %v84_v46  }
  0x89   :  { %89 = vst.msk [vmem:[#allocation2 + $0x14] sm:$0xf0] %vm61_vm5, %v84_v46  }
  0x8a   :  { %136 = vst.msk [vmem:[#allocation2 + $0x10] sm:$0xf] %vm110_vm6, %v133_v44  }
  0x8b   :  { %138 = vst.msk [vmem:[#allocation2 + $0x14] sm:$0xf0] %vm110_vm6, %v133_v44   ;;  %v329_v48 = vpop.permute.xlu2 %328  }
  0x8c   :  { %185 = vst.msk [vmem:[#allocation2 + $0x10] sm:$0xf] %vm159_vm7, %v182_v42  }
  0x8d   :  { %187 = vst.msk [vmem:[#allocation2 + $0x14] sm:$0xf0] %vm159_vm7, %v182_v42   ;;  %v231_v47 = vpop.permute.xlu1 %230  }
  0x8e   :  { %234 = vst.msk [vmem:[#allocation2 + $0x10] sm:$0xf] %vm208_vm8, %v231_v47  }
  0x8f   :  { %v207_v49 = vpop.permute.xlu0 %206   ;;  %236 = vst.msk [vmem:[#allocation2 + $0x14] sm:$0xf0] %vm208_vm8, %v231_v47  }
  0x90   :  { %209 = vst.msk [vmem:[#allocation2] sm:$0xf] %vm208_vm8, %v207_v49  }
  0x91   :  { %211 = vst.msk [vmem:[#allocation2 + $0x4] sm:$0xf0] %vm208_vm8, %v207_v49  }
  0x92   :  { %258 = vst.msk [vmem:[#allocation2] sm:$0xf] %vm257_vm9, %v256_v45  }
  0x93   :  { %260 = vst.msk [vmem:[#allocation2 + $0x4] sm:$0xf0] %vm257_vm9, %v256_v45  }
  0x95   :  { %v305_v50 = vpop.permute.xlu1 %304  }
  0x96   :  { %307 = vst.msk [vmem:[#allocation2] sm:$0xf] %vm306_vm10, %v305_v50  }
  0x97   :  { %v280_v51 = vpop.permute.xlu0 %279   ;;  %309 = vst.msk [vmem:[#allocation2 + $0x4] sm:$0xf0] %vm306_vm10, %v305_v50  }
  0x98   :  { %283 = vst.msk [vmem:[#allocation2 + $0x10] sm:$0xf] %vm257_vm9, %v280_v51  }
  0x99   :  { %285 = vst.msk [vmem:[#allocation2 + $0x14] sm:$0xf0] %vm257_vm9, %v280_v51  }
  0x9a   :  { %332 = vst.msk [vmem:[#allocation2 + $0x10] sm:$0xf] %vm306_vm10, %v329_v48  }
  0x9b   :  { %334 = vst.msk [vmem:[#allocation2 + $0x14] sm:$0xf0] %vm306_vm10, %v329_v48  }
  0x9d   :  { %v378_v52 = vpop.permute.xlu1 %377  }
  0x9e   :  { %381 = vst.msk [vmem:[#allocation2 + $0x10] sm:$0xf] %vm355_vm11, %v378_v52  }
  0x9f   :  { %v354_v53 = vpop.permute.xlu0 %353   ;;  %383 = vst.msk [vmem:[#allocation2 + $0x14] sm:$0xf0] %vm355_vm11, %v378_v52  }
  0xa0   :  { %356 = vst.msk [vmem:[#allocation2] sm:$0xf] %vm355_vm11, %v354_v53  }
  0xa1   :  { %358 = vst.msk [vmem:[#allocation2 + $0x4] sm:$0xf0] %vm355_vm11, %v354_v53  }
  0xa5   :  { %v397_v54 = vld [vmem:[#allocation2 + $0x10] sm:$0xf] }
  0xa6   :  { %410 = vst [vmem:[%s534_s1 + $0x8] sm:$0xf] %v397_v54  ;;  %v403_v55 = vld [vmem:[#allocation2 + $0x18] sm:$0xf] }
  0xa7   :  { %411 = vst [vmem:[%s534_s1 + $0xc] sm:$0xf] %v403_v55  ;;  %v386_v56 = vld [vmem:[#allocation2] sm:$0xf] }
  0xa8   :  { %389 = vst [vmem:[%s534_s1] sm:$0xf] %v386_v56  ;;  %v391_v57 = vld [vmem:[#allocation2 + $0x8] sm:$0xf] }
  0xa9   :  { %409 = vst [vmem:[%s534_s1 + $0x4] sm:$0xf] %v391_v57 }
  0xaa   :  { %408 = vsyncpa [#allocation1], 1 }

// kernel: sparse_conv_net_forward.1
= control target key start
LH: loop header
LB: loop body
LE: loop exit
PB: predicated region body
PF: predicated region fallthrough
CT: control target
= control target key end

     0   :  { %s862_s27 = smov 0   ;;  %s864_s28 = smov 0   ;;  %s959_s0 = inlined_call_operand.vmem [shape: f32[2,4,256], index: 0, kind: input, shape index: {}]   ;;  %s960_s1 = inlined_call_operand.vmem [shape: f32[2,1,256], index: 1, kind: input, shape index: {}]   ;;  %s961_s2 = inlined_call_operand.vmem [shape: bf16[32,3], index: 2, kind: input, shape index: {}]   ;;  %s962_s3 = inlined_call_operand.vmem [shape: f32[32,1], index: 3, kind: input, shape index: {}]   ;;  %s963_s4 = inlined_call_operand.vmem [shape: f32[32,1], index: 4, kind: input, shape index: {}]   ;;  %s964_s5 = inlined_call_operand.vmem [shape: bf16[3,3], index: 5, kind: input, shape index: {}]   ;;  %s965_s6 = inlined_call_operand.vmem [shape: bf16[3,32], index: 6, kind: input, shape index: {}]   ;;  %s966_s7 = inlined_call_operand.vmem [shape: f32[3,1], index: 7, kind: input, shape index: {}]   ;;  %s967_s8 = inlined_call_operand.vmem [shape: bf16[2,3,256], index: 8, kind: output, shape index: {}]  }
   0x1   :  { %s866_s29 = smov 0  }
   0x2 LB: > { %s30_s30 = sadd.s32 1, %s809_s28  ;;  %p724_p0 = scmp.ge.s32.totalorder %s813_s29, 1  ;;  %s813_s29 = sphi %s866_s29, %s18_s29   ;;  %s809_s28 = sphi %s864_s28, %s969_s28   ;;  %s805_s27 = sphi %s862_s27, %s968_s27  }
   0x3   : > { %p32_p1 = scmp.ge.s32.totalorder %s30_s30, 2  ;;  %p299_p2 = scmp.lt.s32.totalorder %s813_s29, 3 }
   0x5   : > { %s971_s30 = smov (%p32_p1, %s30_s30), 0  ;;  %p300_p3 = pnand %p724_p0, %p299_p2 }
   0x6   : > { %p350_p4 = scmp.lt.s32.totalorder (!%p300_p3), %s805_s27, 1 }
   0x7   : > { %303 = sbr.rel (%p300_p3) target bundleno = 354 (0x162), region = 52 }
   0xc   : > { %s973_s27 = smov (!%p350_p4, %s805_s27), 1  ;;  %v396_v0 = vld [vmem:[%s962_s3 + $0x10] sm:$0xff]  ;;  %v394_v1 = vld [vmem:[%s962_s3] sm:$0xff]  ;;  %v815_v2 = vmov 0   ;;  %vm435_vm0 = vcmask 1040384   ;;  %v494_v5 = vld [vmem:[%s963_s4 + $0x18] sm:$0xff] }
   0xd   : > { %779 = vset.pattern.permute.xlu1 %v815_v2  ;;  %778 = vset.pattern.permute.xlu0 %v815_v2  ;;  %s748_s13 = sshll.u32 %s973_s27, 3  ;;  %v493_v4 = vld [vmem:[%s963_s4 + $0x10] sm:$0xff]  ;;  %v397_v7 = vld [vmem:[%s962_s3 + $0x18] sm:$0xff]  ;;  %v395_v8 = vld [vmem:[%s962_s3 + $0x8] sm:$0xff]  ;;  %vm436_vm1 = vcmask 1041408   ;;  %v816_v9 = vmov 65535  }
   0xe   : > { %410 = vperm.xlu0 %778, %v396_v0   ;;  %400 = vperm.xlu1 %779, %v394_v1   ;;  %s357_s16 = scalar_lea.vmem %s959_s0, %s748_s13  ;;  %v781_v6 = vpack.i.bf16 %v494_v5, %v493_v4  ;;  %v437_v10 = vsel %vm435_vm0, 4294967295, %v816_v9  ;;  %v491_v11 = vld [vmem:[%s963_s4] sm:$0xff]  ;;  %v492_v12 = vld [vmem:[%s963_s4 + $0x8] sm:$0xff]  ;;  %vm428_vm2 = vcmask 23552   ;;  %s727_s17 = sshll.u32 %s973_s27, 1  ;;  %vm534_vm6 = vcmask 261120  }
   0xf   : > { %780 = vset.pattern.permute.xlu2 %v815_v2  ;;  %v379_v3 = vld [vmem:[%s357_s16] sm:$0x77]  ;;  %v438_v13 = vsel %vm436_vm1, %v437_v10, 0  ;;  %v786_v16 = vpack.i.bf16 %v492_v12, %v491_v11  ;;  %v751_v23 = vld [vmem:[%s961_s2 + $0x8] sm:$0xff]  ;;  %s366_s20 = scalar_lea.vmem %s960_s1, %s727_s17  ;;  %vm609_vm7 = vsmask.f32 1280 }
  0x10   : > { %381 = vst [vmem:[#allocation1] ss:$2 sm:$0xff] %v379_v3  ;;  %782 = vperm.xlu2 %780, %v781_v6   ;;  %v593_v21 = vld [vmem:[%s966_s7] sm:$0x7]  ;;  %vm611_vm8 = vcmask 1043458   ;;  %s749_s25 = sshll.u32 %s973_s27, 2  ;;  %vm610_vm10 = vmand %vm436_vm1, %vm609_vm7 }
  0x11   : > { %v750_v22 = vld [vmem:[%s961_s2] sm:$0xff]  ;;  %vm612_vm9 = vsmask.f32 3328  ;;  %s376_s10 = scalar_lea.vmem %s967_s8, %s749_s25 }
  0x12   : > { %v388_v31 = vld [vmem:[%s366_s20] sm:$0x3]  ;;  %vm613_vm11 = vmand %vm611_vm8, %vm612_vm9 }
  0x13   : > { %vm389_vm3 = vcmp.ne.f32.partialorder %v388_v31, 0.0  ;;  %v529_v10 = vld [vmem:[%s965_s6] sm:$0x3]  ;;  %vm614_vm12 = vmor %vm613_vm11, %vm610_vm10 }
  0x14   : > { %v495_v37 = vsel %vm389_vm3, 1, %v815_v2  ;;  %v528_v11 = vld [vmem:[%s964_s5] sm:$0x3] }
  0x15   : > { %v496_v47 = vperm.slane %v495_v37, 0  ;;  %v497_v48 = vperm.slane %v495_v37, 1 }
  0x16   : > { %415 = vperm.xlu0 %778, %v397_v7   ;;  %405 = vperm.xlu1 %779, %v395_v8  }
  0x17   : > { %v382_v14 = vld.sshfl [vmem:[#allocation1] sm:$0xff pattern:$0x75316420]  ;;  %v383_v15 = vld.sshfl [vmem:[#allocation1 + $0x8] sm:$0xff pattern:$0x75316420] }
  0x18   : > { %v386_v17 = vpack.c.bf16 %v382_v14, %v382_v14  ;;  %v387_v18 = vpack.c.bf16 %v383_v15, %v383_v15  ;;  %787 = vperm.xlu2 %780, %v786_v16   ;;  %vm498_vm4 = vcmp.eq.s32.totalorder %v496_v47, 1  ;;  %vm499_vm5 = vcmp.eq.s32.totalorder %v497_v48, 1 }
  0x1a   : > { %v911_v19 = vand.u32 %v438_v13, %v386_v17  ;;  %v913_v20 = vand.u32 %v438_v13, %v387_v18 }
  0x1c   : > { %452 = vmatpush.bf16.msra.mxu0 %v911_v19  ;;  %471 = vmatpush.bf16.msra.mxu1 %v913_v20 }
  0x1e   : > { %596 = vperm.xlu0 %778, %v593_v21  }
  0x1f   : > { %738 = vmatmul.msk.bf16.vlgmr.msra.gmra.mxu0 %vm428_vm2, %v750_v22  ;;  %740 = vmatmul.msk.bf16.vlgmr.msra.gmra.mxu1 %vm428_vm2, %v750_v22 }
  0x2f   : > { %739 = vmatmul.msk.bf16.gmra.mxu0 %vm428_vm2, %v751_v23  ;;  %741 = vmatmul.msk.bf16.gmra.mxu1 %vm428_vm2, %v751_v23 }
  0x6a   : > { %v783_v29 = vpop.permute.xlu2 %782 }
  0x6b   : > { %v784_v38 = vunpack.i.l.bf16 %v783_v29  ;;  %v785_v53 = vunpack.i.h.bf16 %v783_v29 }
  0x72   : > { %v788_v39 = vpop.permute.xlu2 %787 }
  0x73   : > { %v790_v54 = vunpack.i.h.bf16 %v788_v39  ;;  %v789_v55 = vunpack.i.l.bf16 %v788_v39 }
  0x80   : > { %v401_v28 = vpop.permute.xlu1 %400  ;;  %v411_v30 = vpop.permute.xlu0 %410 }
  0x88   : > { %v406_v34 = vpop.permute.xlu1 %405  ;;  %v416_v40 = vpop.permute.xlu0 %415 }
  0x9c   : > { %v454_v24 = vpop.f32.mrf.mxu0  ;;  %v473_v25 = vpop.f32.mrf.mxu1 }
  0x9d   : > { %v455_v43 = vadd.f32 %v454_v24, %v401_v28  ;;  %v474_v44 = vadd.f32 %v473_v25, %v401_v28  ;;  %v615_v25 = vld [vmem:[%s376_s10] sm:$0xf] }
  0x9f   : > { %v483_v60 = vmax.f32 %v455_v43, 0.0  ;;  %v484_v61 = vmax.f32 %v474_v44, 0.0 }
  0xa1   : > { %v520_v6 = vsel %vm498_vm4, %v483_v60, %v789_v55  ;;  %v521_v7 = vsel %vm499_vm5, %v484_v61, %v789_v55 }
  0xa4   : > { %v456_v26 = vpop.f32.mrf.mxu0  ;;  %v475_v27 = vpop.f32.mrf.mxu1 }
  0xa5   : > { %v457_v41 = vadd.f32 %v456_v26, %v406_v34  ;;  %v476_v42 = vadd.f32 %v475_v27, %v406_v34 }
  0xa7   : > { %v485_v56 = vmax.f32 %v457_v41, 0.0  ;;  %v486_v57 = vmax.f32 %v476_v42, 0.0 }
  0xa9   : > { %v522_v4 = vsel %vm498_vm4, %v485_v56, %v790_v54  ;;  %v523_v5 = vsel %vm499_vm5, %v486_v57, %v790_v54 }
  0xaa   : > { %v530_v8 = vpack.c.bf16 %v522_v4, %v520_v6  ;;  %v531_v9 = vpack.c.bf16 %v523_v5, %v521_v7 }
  0xac   : > { %v459_v32 = vpop.f32.mrf.mxu0  ;;  %v478_v33 = vpop.f32.mrf.mxu1 }
  0xad   : > { %v460_v35 = vadd.f32 %v459_v32, %v411_v30  ;;  %v479_v36 = vadd.f32 %v478_v33, %v411_v30 }
  0xaf   : > { %v487_v49 = vmax.f32 %v460_v35, 0.0  ;;  %v488_v50 = vmax.f32 %v479_v36, 0.0 }
  0xb1   : > { %v524_v62 = vsel %vm498_vm4, %v487_v49, %v784_v38  ;;  %v525_v0 = vsel %vm499_vm5, %v488_v50, %v784_v38 }
  0xb4   : > { %v461_v45 = vpop.f32.mrf.mxu0  ;;  %v480_v46 = vpop.f32.mrf.mxu1 }
  0xb5   : > { %v462_v51 = vadd.f32 %v461_v45, %v416_v40  ;;  %v481_v52 = vadd.f32 %v480_v46, %v416_v40 }
  0xb7   : > { %v489_v58 = vmax.f32 %v462_v51, 0.0  ;;  %v490_v59 = vmax.f32 %v481_v52, 0.0 }
  0xb9   : > { %v526_v63 = vsel %vm498_vm4, %v489_v58, %v785_v53  ;;  %v527_v1 = vsel %vm499_vm5, %v490_v59, %v785_v53 }
  0xba   : > { %v532_v2 = vpack.c.bf16 %v526_v63, %v524_v62  ;;  %v533_v3 = vpack.c.bf16 %v527_v1, %v525_v0 }
  0xbc   : > { %544 = vmatpush.bf16.msra.mxu2 %v532_v2  ;;  %557 = vmatpush.bf16.msra.mxu3 %v533_v3 }
  0xc0   : > { %545 = vmatpush.bf16.msra.mxu2 %v530_v8  ;;  %558 = vmatpush.bf16.msra.mxu3 %v531_v9 }
  0xc3   : > { %742 = vmatmul.msk.bf16.vlgmr.msra.gmra.mxu2 %vm534_vm6, %v529_v10  ;;  %743 = vmatmul.msk.bf16.vlgmr.msra.gmra.mxu3 %vm534_vm6, %v529_v10 }
  0xc4   : > { %574 = vmatpush.bf16.msrb.mxu2 %v911_v19  ;;  %587 = vmatpush.bf16.msrb.mxu3 %v913_v20  ;;  %v597_v20 = vpop.permute.xlu0 %596 }
  0xd3   : > { %744 = vmatmul.msk.bf16.vlgmr.msrb.gmra.mxu2 %vm428_vm2, %v528_v11  ;;  %745 = vmatmul.msk.bf16.vlgmr.msrb.gmra.mxu3 %vm428_vm2, %v528_v11 }
 0x146   : > { %v547_v12 = vpop.f32.mrf.mxu2  ;;  %v560_v13 = vpop.f32.mrf.mxu3 }
 0x14e   : > { %v549_v14 = vpop.f32.mrf.mxu2  ;;  %v562_v15 = vpop.f32.mrf.mxu3 }
 0x156   : > { %v576_v16 = vpop.f32.mrf.mxu2  ;;  %v589_v17 = vpop.f32.mrf.mxu3 }
 0x157   : > { %v577_v18 = vadd.f32 %v576_v16, %v547_v12  ;;  %v590_v19 = vadd.f32 %v589_v17, %v560_v13 }
 0x159   : > { %v599_v21 = vadd.f32 %v597_v20, %v577_v18  ;;  %v600_v22 = vadd.f32 %v597_v20, %v590_v19 }
 0x15b   : > { %v601_v23 = vpack.c.bf16 %v600_v22, %v599_v21 }
 0x15d   : > { %v603_v24 = vrot.slane %v601_v23, 2 }
 0x15e   : > { %v578_v26 = vpop.f32.mrf.mxu2  ;;  %v591_v27 = vpop.f32.mrf.mxu3 }
 0x15f   : > { %v606_v28 = vsel %vm436_vm1, %v601_v23, %v603_v24 }
 0x160   : > { %v616_v29 = vsel %vm614_vm12, %v606_v28, %v615_v25 }
 0x161   : > { %617 = vst [vmem:[%s376_s10] sm:$0xf] %v616_v29 }
 0x162 PF: > { %s18_s29 = sadd.s32 1, %s813_s29   ;;  %s968_s27 = smov %s809_s28 }
 0x163   : > { %p15_p5 = scmp.ge.s32.totalorder %s18_s29, 4   ;;  %s969_s28 = smov %s971_s30 }
 0x165   :  { %17 = sbr.rel (!%p15_p5) target bundleno = 2 (0x2), region = 85 }

</bundles_post_ra>
